<compile_context>
chip_gen: v7x
topology: tpu7x:2x2x1
jax: 0.10.0
libtpu: 0.0.40
codegen_flags: <defaults>
</compile_context>

<pallas_src>
import functools

import jax
import jax.numpy as jnp
from jax.scipy.stats import norm
from jax.experimental import pallas as pl
from jax.experimental.pallas import tpu as pltpu

LANES = 128  # lane-dense padded width of the activation / output slabs


# ----------------------------------------------------------------------------
# Fused kernel
# ----------------------------------------------------------------------------
def _fused_moe_resblock_kernel(x_ref,     # (C, 128) f32   input, lanes [0, B*L) real, rest zero
                               w_ref,     # (2, C, 3C) bf16  [0]=body[0] conv, [1]=expert conv (im2col layout)
                               aux_ref,   # (128, 128) f32  avg-pool matrix + packed BN params (last C rows)
                               out_ref,   # (C, 128) f32   cols [0,N)=block output, [N,N+B)=gate features
                               *, C, B, L):
    NP = x_ref.shape[1]
    N = B * L
    inv_n = jnp.float32(1.0 / N)

    # Per-sample halo / validity masks (hoisted; reused by both convs and both BNs).
    lane = jax.lax.broadcasted_iota(jnp.int32, (1, NP), 1)
    pos = lane % L
    not_first = pos != 0          # lane is not the first element of its sample
    not_last = pos != (L - 1)     # lane is not the last element of its sample
    valid = lane < N              # lane holds real data (not padding)

    def taps3(h):
        # k=3 'same'-padding im2col (3C, NP) built with XLU lane-rolls + edge masks.
        #   rows [0:C)   -> tap k=0 (h[l-1], zero at per-sample left edge)
        #   rows [C:2C)  -> tap k=1 (h[l])
        #   rows [2C:3C) -> tap k=2 (h[l+1], zero at per-sample right edge)
        left = jnp.where(not_first, pltpu.roll(h, shift=1, axis=1), 0.0)
        right = jnp.where(not_last, pltpu.roll(h, shift=NP - 1, axis=1), 0.0)
        # bf16 cast forces a single MXU pass per conv; accumulation stays f32.
        return jnp.concatenate([left, h, right], axis=0).astype(jnp.bfloat16)

    def bn_fold(y, gamma, beta):
        # Train-mode BatchNorm1d folded into one per-channel scale/shift.
        # Two-pass stats (mean, then masked centered sum of squares) over the N real lanes only.
        # The conv bias cancels exactly under train-mode BN, so it never enters the kernel.
        m = jnp.sum(y, axis=1, keepdims=True) * inv_n            # padded lanes of y are exactly 0
        cen = jnp.where(valid, y - m, 0.0)
        var = jnp.sum(cen * cen, axis=1, keepdims=True) * inv_n  # biased variance, as in PyTorch train mode
        scale = gamma * jax.lax.rsqrt(var + 1e-5)
        return scale, beta - m * scale

    x = x_ref[...]                                               # (C, NP)
    aux = aux_ref[...]                                           # (NP, NP); also feeds the gate-pool matmul
    g1, bt1 = aux[NP - C:, 0:1], aux[NP - C:, 1:2]               # body[1] BN gamma/beta
    g2, bt2 = aux[NP - C:, 2:3], aux[NP - C:, 3:4]               # body[4] BN gamma/beta

    # body[0] Conv1d(C, C, 3, padding='same') — one bf16 MXU push
    c1 = jnp.dot(w_ref[0], taps3(x), preferred_element_type=jnp.float32)     # (C, NP)
    # body[1] BatchNorm1d (train stats) + body[2] ReLU, single FMA epilogue; zero padded lanes so they
    # cannot pollute the second conv's statistics or the gate features.
    sc1, sh1 = bn_fold(c1, g1, bt1)
    h = jnp.where(valid, jnp.maximum(c1 * sc1 + sh1, 0.0), 0.0)

    # MoE gate features: AdaptiveAvgPool1d((1,)) + flatten == mean over L per (sample, channel).
    # aux is the host-built (lane -> sample) 1/L pooling matrix targeting output columns [N, N+B);
    # its last C rows carry the BN params but multiply zeroed padded lanes of h, so they contribute nothing.
    gate = jnp.dot(h, aux, preferred_element_type=jnp.float32)               # (C, NP), nonzero only in [N,N+B)

    # body[3] shared-expert Conv1d(C, C, 3, padding=1).  Experts are weight-tied and each sample's top-k
    # gate softmax sums to exactly 1.0, so SparseDispatcher dispatch/combine reduces to expert(h).
    c2 = jnp.dot(w_ref[1], taps3(h), preferred_element_type=jnp.float32)     # (C, NP)
    # body[4] BatchNorm1d + residual add (x_transform = Identity) + final ReLU
    sc2, sh2 = bn_fold(c2, g2, bt2)
    final = jnp.maximum(c2 * sc2 + sh2 + x, 0.0)

    # Single unmasked 128-lane store: real lanes take the block output, lanes [N,N+B) take gate features.
    out_ref[...] = jnp.where(valid, final, gate)


def fused_moe_resblock(x_pad, w_slab, aux, *, C, B, L):
    NP = x_pad.shape[1]
    kernel = functools.partial(_fused_moe_resblock_kernel, C=C, B=B, L=L)
    return pl.pallas_call(
        kernel,
        out_shape=jax.ShapeDtypeStruct((C, NP), jnp.float32),
        in_specs=[pl.BlockSpec(memory_space=pltpu.MemorySpace.VMEM)] * 3,
        out_specs=pl.BlockSpec(memory_space=pltpu.MemorySpace.VMEM),
    )(x_pad, w_slab, aux)


# ----------------------------------------------------------------------------
# Plain-JAX glue: noisy top-k gating (tiny [B, E] math — exact reproduction of MoE.noisy_top_k_gating)
# ----------------------------------------------------------------------------
def _cv_squared(v):
    eps = 1e-10
    if v.shape[0] == 1:
        return jnp.zeros((), v.dtype)
    return jnp.var(v, ddof=1) / (jnp.mean(v) ** 2 + eps)


def _prob_in_top_k(clean, noisy, noise_stddev, top_values, k):
    threshold_if_in = top_values[:, k:k + 1]        # (k+1)-th largest per row
    threshold_if_out = top_values[:, k - 1:k]
    is_in = noisy > threshold_if_in
    prob_if_in = norm.cdf((clean - threshold_if_in) / noise_stddev)
    prob_if_out = norm.cdf((clean - threshold_if_out) / noise_stddev)
    return jnp.where(is_in, prob_if_in, prob_if_out)


def noisy_top_k_gating(gate_x, w_gate, w_noise, key, k, temperature, train=True, noise_eps=1e-2):
    num_experts = w_gate.shape[1]
    clean_logits = gate_x @ w_gate                  # zeros (w_gate init is torch.zeros)
    raw_noise_stddev = gate_x @ w_noise
    noise_stddev = (jax.nn.softplus(raw_noise_stddev) + noise_eps) * (1.0 if train else 0.0)
    noisy_logits = clean_logits + jax.random.normal(key, clean_logits.shape) * noise_stddev
    logits = jax.nn.softmax(noisy_logits / temperature, axis=1)
    m = min(k + 1, num_experts)
    top_logits, top_indices = jax.lax.top_k(logits, m)
    top_k_logits = top_logits[:, :k]
    top_k_indices = top_indices[:, :k]
    top_k_gates = jax.nn.softmax(top_k_logits, axis=1)
    batch_idx = jnp.arange(gate_x.shape[0])[:, None]
    gates = jnp.zeros_like(logits).at[batch_idx, top_k_indices].set(top_k_gates)
    # Guard the smooth-load path with `train` too: with train=False noise_stddev is 0 and the
    # _prob_in_top_k division would produce inf/NaN.
    if k < num_experts and train:                   # noisy_gating=True path
        load = _prob_in_top_k(clean_logits, noisy_logits, noise_stddev, top_logits, k).sum(0)
    else:
        load = (gates > 0).sum(0).astype(jnp.float32)
    return gates, load


# ----------------------------------------------------------------------------
# Parameters (deterministic synthetic init; shapes from the module's __init__, PyTorch layouts)
# ----------------------------------------------------------------------------
def init_params(key, c, num_experts):
    k1, k2, k3, k4 = jax.random.split(key, 4)
    return {
        # body[0]: Conv1d(c, c, 3) weight in PyTorch (C_out, C_in, K) layout
        "w1": jax.random.normal(k1, (c, c, 3), jnp.float32) * 0.1,
        "b1": jax.random.normal(k2, (c, 1), jnp.float32) * 0.1,   # cancels under train-mode BN; not DMA'd
        # body[1]: BatchNorm1d default init
        "g1": jnp.ones((c, 1), jnp.float32),
        "beta1": jnp.zeros((c, 1), jnp.float32),
        # MoE expert: Conv1d(c, c, 3, padding=1); all experts share expert 0's weights
        "we": jax.random.normal(k3, (c, c, 3), jnp.float32) * 0.1,
        "be": jax.random.normal(k4, (c, 1), jnp.float32) * 0.1,   # cancels under train-mode BN; not DMA'd
        # body[4]: BatchNorm1d
        "g2": jnp.ones((c, 1), jnp.float32),
        "beta2": jnp.zeros((c, 1), jnp.float32),
        # gating params: torch.zeros init in the module
        "w_gate": jnp.zeros((c, num_experts), jnp.float32),
        "w_noise": jnp.zeros((c, num_experts), jnp.float32),
    }


# ----------------------------------------------------------------------------
# Full forward
# ----------------------------------------------------------------------------
def moe_resblock_forward(x, params, noise_key, top_k=2, temperature=1.0, train=True, loss_coef=0.01):
    B, C, L = x.shape
    N = B * L
    NP = LANES
    # Packing constraints for the merged 128-lane slabs (gate cols and param rows must sit in padding).
    assert N + B <= NP and N <= NP - C, "B*L too large for the single-slab layout; grid the lane axis."

    # --- Lane-dense layout plumbing (tiny host-side XLA ops, no extra pallas launches) ---------------
    x_flat = jnp.transpose(x, (1, 0, 2)).reshape(C, N)                     # (C, B*L)
    x_pad = jnp.pad(x_flat, ((0, 0), (0, NP - N)))                         # (C, 128), padded lanes zero

    # Conv weights flattened for im2col: W_flat[co, k*C + ci] = W[co, ci, k]; stacked + bf16 (one MXU pass)
    w1f = jnp.transpose(params["w1"], (0, 2, 1)).reshape(C, 3 * C)
    wef = jnp.transpose(params["we"], (0, 2, 1)).reshape(C, 3 * C)
    w_slab = jnp.stack([w1f, wef], axis=0).astype(jnp.bfloat16)            # (2, C, 3C)

    # aux slab: compile-time average-pool matrix (lane -> sample mean, writes output cols [N, N+B))
    # plus the four per-channel BN vectors packed into the last C rows, cols 0..3.
    rows = jnp.arange(N)
    aux = jnp.zeros((NP, NP), jnp.float32).at[rows, N + rows // L].set(1.0 / L)
    pvec = jnp.concatenate([params["g1"], params["beta1"], params["g2"], params["beta2"]], axis=1)  # (C, 4)
    aux = aux.at[NP - C:, 0:4].set(pvec)

    # --- One fused Pallas launch: conv+BN+ReLU, gate pooling, expert conv+BN, residual, final ReLU ----
    out_slab = fused_moe_resblock(x_pad, w_slab, aux, C=C, B=B, L=L)       # (C, 128)

    out = out_slab[:, :N].reshape(C, B, L).transpose(1, 0, 2)              # back to (B, C, L)
    gate_x = out_slab[:, N:N + B].T                                        # (B, C) gate features

    # MoE gating (loss only — the weight-tied expert/combine is already inside the fused kernel)
    gates, load = noisy_top_k_gating(gate_x, params["w_gate"], params["w_noise"], noise_key,
                                     top_k, temperature, train=train)
    importance = gates.sum(0)
    moe_loss = (_cv_squared(importance) + _cv_squared(load)) * loss_coef
    return out, moe_loss


if __name__ == "__main__":
    B, C, L = 4, 8, 16            # in_channels == out_channels == 8, stride=1, bottleneck=False
    NUM_EXPERTS, TOP_K = 4, 2
    key = jax.random.PRNGKey(0)
    kp, kx, kn = jax.random.split(key, 3)
    params = init_params(kp, C, NUM_EXPERTS)
    x = jax.random.normal(kx, (B, C, L), jnp.float32)
    out, loss = moe_resblock_forward(x, params, kn, top_k=TOP_K, temperature=1.0, train=True)
    jax.block_until_ready((out, loss))
    assert out.shape == (B, C, L) and out.dtype == jnp.float32
    assert loss.shape == ()
    assert bool(jnp.all(jnp.isfinite(out))) and bool(jnp.isfinite(loss))
    print("KERNEL_OK")
</pallas_src>

<mosaic_0001>
module attributes {stable_mosaic.version = 11 : i64} {
  func.func @_fused_moe_resblock_kernel(%arg0: memref<8x128xf32, #tpu.memory_space<vmem>>, %arg1: memref<2x8x24xbf16, #tpu.memory_space<vmem>>, %arg2: memref<128x128xf32, #tpu.memory_space<vmem>>, %arg3: memref<8x128xf32, #tpu.memory_space<vmem>>) attributes {dimension_semantics = [], scalar_prefetch = 0 : i64, scratch_operands = 0 : i64, tpu.core_type = #tpu.core_type<tc>} {
    %0 = tpu.iota {dimensions = array<i32: 1>} : vector<1x128xi32>
    %c16_i32 = arith.constant 16 : i32
    %c0_i32 = arith.constant 0 : i32
    %1 = arith.cmpi eq, %c16_i32, %c0_i32 : i32
    %c1_i32 = arith.constant 1 : i32
    %2 = arith.select %1, %c1_i32, %c16_i32 : i32
    %3 = vector.broadcast %2 : i32 to vector<1x128xi32>
    %4 = arith.remsi %0, %3 : vector<1x128xi32>
    %c0_i32_0 = arith.constant 0 : i32
    %5 = vector.broadcast %c0_i32_0 : i32 to vector<1x128xi32>
    %6 = arith.cmpi ne, %4, %5 : vector<1x128xi32>
    %c0_i32_1 = arith.constant 0 : i32
    %7 = vector.broadcast %c0_i32_1 : i32 to vector<1x128xi32>
    %8 = arith.cmpi slt, %4, %7 : vector<1x128xi32>
    %c0_i32_2 = arith.constant 0 : i32
    %9 = arith.cmpi slt, %2, %c0_i32_2 : i32
    %10 = vector.broadcast %9 : i1 to vector<1x128xi1>
    %11 = vector.broadcast %10 : vector<1x128xi1> to vector<1x128xi1>
    %12 = arith.xori %8, %11 : vector<1x128xi1>
    %13 = arith.andi %12, %6 : vector<1x128xi1>
    %14 = vector.broadcast %2 : i32 to vector<1x128xi32>
    %15 = arith.addi %4, %14 : vector<1x128xi32>
    %16 = arith.select %13, %15, %4 : vector<1x128xi1>, vector<1x128xi32>
    %c0_i32_3 = arith.constant 0 : i32
    %17 = vector.broadcast %c0_i32_3 : i32 to vector<1x128xi32>
    %18 = arith.cmpi ne, %16, %17 : vector<1x128xi32>
    %c15_i32 = arith.constant 15 : i32
    %19 = vector.broadcast %c15_i32 : i32 to vector<1x128xi32>
    %20 = arith.cmpi ne, %16, %19 : vector<1x128xi32>
    %c64_i32 = arith.constant 64 : i32
    %21 = vector.broadcast %c64_i32 : i32 to vector<1x128xi32>
    %22 = arith.cmpi slt, %0, %21 : vector<1x128xi32>
    %c0 = arith.constant 0 : index
    %c0_4 = arith.constant 0 : index
    %23 = vector.load %arg0[%c0, %c0_4] : memref<8x128xf32, #tpu.memory_space<vmem>>, vector<8x128xf32>
    %c0_5 = arith.constant 0 : index
    %c0_6 = arith.constant 0 : index
    %24 = vector.load %arg2[%c0_5, %c0_6] : memref<128x128xf32, #tpu.memory_space<vmem>>, vector<128x128xf32>
    %25 = vector.extract_strided_slice %24 {offsets = [120, 0], sizes = [8, 1], strides = [1, 1]} : vector<128x128xf32> to vector<8x1xf32>
    %26 = vector.extract_strided_slice %24 {offsets = [120, 1], sizes = [8, 1], strides = [1, 1]} : vector<128x128xf32> to vector<8x1xf32>
    %27 = vector.extract_strided_slice %24 {offsets = [120, 2], sizes = [8, 1], strides = [1, 1]} : vector<128x128xf32> to vector<8x1xf32>
    %28 = vector.extract_strided_slice %24 {offsets = [120, 3], sizes = [8, 1], strides = [1, 1]} : vector<128x128xf32> to vector<8x1xf32>
    %c0_7 = arith.constant 0 : index
    %c0_8 = arith.constant 0 : index
    %c0_9 = arith.constant 0 : index
    %29 = vector.load %arg1[%c0_7, %c0_8, %c0_9] : memref<2x8x24xbf16, #tpu.memory_space<vmem>>, vector<1x8x24xbf16>
    %30 = vector.shape_cast %29 : vector<1x8x24xbf16> to vector<8x24xbf16>
    %c1_i32_10 = arith.constant 1 : i32
    %31 = tpu.dynamic_rotate %23 by %c1_i32_10 dim 1 : vector<8x128xf32>, i32 -> vector<8x128xf32>
    %cst = arith.constant 0.000000e+00 : f32
    %32 = vector.shape_cast %18 : vector<1x128xi1> to vector<1x128xi1>
    %33 = vector.broadcast %32 : vector<1x128xi1> to vector<8x128xi1>
    %34 = vector.broadcast %cst : f32 to vector<8x128xf32>
    %35 = arith.select %33, %31, %34 : vector<8x128xi1>, vector<8x128xf32>
    %c127_i32 = arith.constant 127 : i32
    %36 = tpu.dynamic_rotate %23 by %c127_i32 dim 1 : vector<8x128xf32>, i32 -> vector<8x128xf32>
    %cst_11 = arith.constant 0.000000e+00 : f32
    %37 = vector.shape_cast %20 : vector<1x128xi1> to vector<1x128xi1>
    %38 = vector.broadcast %37 : vector<1x128xi1> to vector<8x128xi1>
    %39 = vector.broadcast %cst_11 : f32 to vector<8x128xf32>
    %40 = arith.select %38, %36, %39 : vector<8x128xi1>, vector<8x128xf32>
    %41 = tpu.concatenate %35, %23, %40 in 0 : vector<8x128xf32>, vector<8x128xf32>, vector<8x128xf32> -> vector<24x128xf32>
    %42 = arith.truncf %41 : vector<24x128xf32> to vector<24x128xbf16>
    %cst_12 = arith.constant dense<0.000000e+00> : vector<8x128xf32>
    %43 = tpu.matmul %30, %42, %cst_12 {dimension_numbers = #tpu.dot_dimension_numbers<[1], [0], [0], [1], [0, 0, 1, 1], [], []>} : vector<8x24xbf16>, vector<24x128xbf16>, vector<8x128xf32> -> vector<8x128xf32>
    %cst_13 = arith.constant dense<0.000000e+00> : vector<8xf32>
    %44 = vector.multi_reduction <add>, %43, %cst_13 [1] : vector<8x128xf32> to vector<8xf32>
    %45 = vector.shape_cast %44 : vector<8xf32> to vector<8x1xf32>
    %cst_14 = arith.constant 1.562500e-02 : f32
    %46 = vector.broadcast %cst_14 : f32 to vector<8x1xf32>
    %47 = arith.mulf %45, %46 : vector<8x1xf32>
    %48 = vector.broadcast %47 : vector<8x1xf32> to vector<8x128xf32>
    %49 = arith.subf %43, %48 : vector<8x128xf32>
    %cst_15 = arith.constant 0.000000e+00 : f32
    %50 = vector.shape_cast %22 : vector<1x128xi1> to vector<1x128xi1>
    %51 = vector.broadcast %50 : vector<1x128xi1> to vector<8x128xi1>
    %52 = vector.broadcast %cst_15 : f32 to vector<8x128xf32>
    %53 = arith.select %51, %49, %52 : vector<8x128xi1>, vector<8x128xf32>
    %54 = arith.mulf %53, %53 : vector<8x128xf32>
    %cst_16 = arith.constant dense<0.000000e+00> : vector<8xf32>
    %55 = vector.multi_reduction <add>, %54, %cst_16 [1] : vector<8x128xf32> to vector<8xf32>
    %56 = vector.shape_cast %55 : vector<8xf32> to vector<8x1xf32>
    %cst_17 = arith.constant 1.562500e-02 : f32
    %57 = vector.broadcast %cst_17 : f32 to vector<8x1xf32>
    %58 = arith.mulf %56, %57 : vector<8x1xf32>
    %cst_18 = arith.constant 9.99999974E-6 : f32
    %59 = vector.broadcast %cst_18 : f32 to vector<8x1xf32>
    %60 = arith.addf %58, %59 : vector<8x1xf32>
    %61 = math.rsqrt %60 : vector<8x1xf32>
    %62 = arith.mulf %25, %61 : vector<8x1xf32>
    %63 = arith.mulf %47, %62 : vector<8x1xf32>
    %64 = arith.subf %26, %63 : vector<8x1xf32>
    %65 = vector.broadcast %62 : vector<8x1xf32> to vector<8x128xf32>
    %66 = arith.mulf %43, %65 : vector<8x128xf32>
    %67 = vector.broadcast %64 : vector<8x1xf32> to vector<8x128xf32>
    %68 = arith.addf %66, %67 : vector<8x128xf32>
    %cst_19 = arith.constant 0.000000e+00 : f32
    %69 = vector.broadcast %cst_19 : f32 to vector<8x128xf32>
    %70 = arith.maximumf %68, %69 : vector<8x128xf32>
    %cst_20 = arith.constant 0.000000e+00 : f32
    %71 = vector.shape_cast %22 : vector<1x128xi1> to vector<1x128xi1>
    %72 = vector.broadcast %71 : vector<1x128xi1> to vector<8x128xi1>
    %73 = vector.broadcast %cst_20 : f32 to vector<8x128xf32>
    %74 = arith.select %72, %70, %73 : vector<8x128xi1>, vector<8x128xf32>
    %cst_21 = arith.constant dense<0.000000e+00> : vector<8x128xf32>
    %75 = tpu.matmul %74, %24, %cst_21 {dimension_numbers = #tpu.dot_dimension_numbers<[1], [0], [0], [1], [0, 0, 1, 1], [], []>} : vector<8x128xf32>, vector<128x128xf32>, vector<8x128xf32> -> vector<8x128xf32>
    %c1 = arith.constant 1 : index
    %c0_22 = arith.constant 0 : index
    %c0_23 = arith.constant 0 : index
    %76 = vector.load %arg1[%c1, %c0_22, %c0_23] : memref<2x8x24xbf16, #tpu.memory_space<vmem>>, vector<1x8x24xbf16>
    %77 = vector.shape_cast %76 : vector<1x8x24xbf16> to vector<8x24xbf16>
    %c1_i32_24 = arith.constant 1 : i32
    %78 = tpu.dynamic_rotate %74 by %c1_i32_24 dim 1 : vector<8x128xf32>, i32 -> vector<8x128xf32>
    %cst_25 = arith.constant 0.000000e+00 : f32
    %79 = vector.shape_cast %18 : vector<1x128xi1> to vector<1x128xi1>
    %80 = vector.broadcast %79 : vector<1x128xi1> to vector<8x128xi1>
    %81 = vector.broadcast %cst_25 : f32 to vector<8x128xf32>
    %82 = arith.select %80, %78, %81 : vector<8x128xi1>, vector<8x128xf32>
    %c127_i32_26 = arith.constant 127 : i32
    %83 = tpu.dynamic_rotate %74 by %c127_i32_26 dim 1 : vector<8x128xf32>, i32 -> vector<8x128xf32>
    %cst_27 = arith.constant 0.000000e+00 : f32
    %84 = vector.shape_cast %20 : vector<1x128xi1> to vector<1x128xi1>
    %85 = vector.broadcast %84 : vector<1x128xi1> to vector<8x128xi1>
    %86 = vector.broadcast %cst_27 : f32 to vector<8x128xf32>
    %87 = arith.select %85, %83, %86 : vector<8x128xi1>, vector<8x128xf32>
    %88 = tpu.concatenate %82, %74, %87 in 0 : vector<8x128xf32>, vector<8x128xf32>, vector<8x128xf32> -> vector<24x128xf32>
    %89 = arith.truncf %88 : vector<24x128xf32> to vector<24x128xbf16>
    %cst_28 = arith.constant dense<0.000000e+00> : vector<8x128xf32>
    %90 = tpu.matmul %77, %89, %cst_28 {dimension_numbers = #tpu.dot_dimension_numbers<[1], [0], [0], [1], [0, 0, 1, 1], [], []>} : vector<8x24xbf16>, vector<24x128xbf16>, vector<8x128xf32> -> vector<8x128xf32>
    %cst_29 = arith.constant dense<0.000000e+00> : vector<8xf32>
    %91 = vector.multi_reduction <add>, %90, %cst_29 [1] : vector<8x128xf32> to vector<8xf32>
    %92 = vector.shape_cast %91 : vector<8xf32> to vector<8x1xf32>
    %cst_30 = arith.constant 1.562500e-02 : f32
    %93 = vector.broadcast %cst_30 : f32 to vector<8x1xf32>
    %94 = arith.mulf %92, %93 : vector<8x1xf32>
    %95 = vector.broadcast %94 : vector<8x1xf32> to vector<8x128xf32>
    %96 = arith.subf %90, %95 : vector<8x128xf32>
    %cst_31 = arith.constant 0.000000e+00 : f32
    %97 = vector.shape_cast %22 : vector<1x128xi1> to vector<1x128xi1>
    %98 = vector.broadcast %97 : vector<1x128xi1> to vector<8x128xi1>
    %99 = vector.broadcast %cst_31 : f32 to vector<8x128xf32>
    %100 = arith.select %98, %96, %99 : vector<8x128xi1>, vector<8x128xf32>
    %101 = arith.mulf %100, %100 : vector<8x128xf32>
    %cst_32 = arith.constant dense<0.000000e+00> : vector<8xf32>
    %102 = vector.multi_reduction <add>, %101, %cst_32 [1] : vector<8x128xf32> to vector<8xf32>
    %103 = vector.shape_cast %102 : vector<8xf32> to vector<8x1xf32>
    %cst_33 = arith.constant 1.562500e-02 : f32
    %104 = vector.broadcast %cst_33 : f32 to vector<8x1xf32>
    %105 = arith.mulf %103, %104 : vector<8x1xf32>
    %cst_34 = arith.constant 9.99999974E-6 : f32
    %106 = vector.broadcast %cst_34 : f32 to vector<8x1xf32>
    %107 = arith.addf %105, %106 : vector<8x1xf32>
    %108 = math.rsqrt %107 : vector<8x1xf32>
    %109 = arith.mulf %27, %108 : vector<8x1xf32>
    %110 = arith.mulf %94, %109 : vector<8x1xf32>
    %111 = arith.subf %28, %110 : vector<8x1xf32>
    %112 = vector.broadcast %109 : vector<8x1xf32> to vector<8x128xf32>
    %113 = arith.mulf %90, %112 : vector<8x128xf32>
    %114 = vector.broadcast %111 : vector<8x1xf32> to vector<8x128xf32>
    %115 = arith.addf %113, %114 : vector<8x128xf32>
    %116 = arith.addf %115, %23 : vector<8x128xf32>
    %cst_35 = arith.constant 0.000000e+00 : f32
    %117 = vector.broadcast %cst_35 : f32 to vector<8x128xf32>
    %118 = arith.maximumf %116, %117 : vector<8x128xf32>
    %119 = vector.shape_cast %22 : vector<1x128xi1> to vector<1x128xi1>
    %120 = vector.broadcast %119 : vector<1x128xi1> to vector<8x128xi1>
    %121 = arith.select %120, %118, %75 : vector<8x128xi1>, vector<8x128xf32>
    %c0_36 = arith.constant 0 : index
    %c0_37 = arith.constant 0 : index
    %122 = vector.load %arg3[%c0_36, %c0_37] : memref<8x128xf32, #tpu.memory_space<vmem>>, vector<8x128xf32>
    tpu.vector_store %arg3[%c0_36, %c0_37], %121 {strides = array<i32>} : memref<8x128xf32, #tpu.memory_space<vmem>>, vector<8x128xf32>,
    return
  }
}

</mosaic_0001>

<bundles_post_ra>
// kernel: tpu_custom_call.1
= control target key start
LH: loop header
LB: loop body
LE: loop exit
PB: predicated region body
PF: predicated region fallthrough
CT: control target
= control target key end

     0   :  { %8 = vsyncpa [#allocation3], 0  ;;  %s744_s0 = inlined_call_operand.hbm [shape: f32[8,128], index: 0, kind: input, shape index: {}]   ;;  %s745_s1 = inlined_call_operand.hbm [shape: bf16[2,8,24], index: 1, kind: input, shape index: {}]   ;;  %s746_s2 = inlined_call_operand.hbm [shape: f32[128,128], index: 2, kind: input, shape index: {}]   ;;  %s747_s3 = inlined_call_operand.hbm [shape: f32[8,128], index: 3, kind: output, shape index: {}]  }
   0x1   :  { %9 = vsyncpa [#allocation6], 0 }
   0x2   :  { %10 = vsyncpa [#allocation4], 0  ;;  %s588_s12 = smov [#allocation5]   ;;  %s494_s16 = scalar_lea.hbm %s745_s1, 128 }
   0x3   :  { %s26_s13 = sshll.u32 %s588_s12, 4  ;;  %p495_p0 = scmp.ne.s32.totalorder %s745_s1, %s494_s16  ;;  %s27_s13 = int_to_ptr.vmem [resolvable:$true] %s26_s13 }
   0x4   :  { %p498_p1 = scmp.lt.u32.totalorder %s494_s16, %s745_s1 }
   0x6   :  { %p500_p2 = pnand %p498_p1, %p495_p0 }
   0x8   :  { %503 = shalt.err (!%p500_p2)
}
   0x9   :  { %s504_s21 = scalar_lea.vmem %s27_s13, 128  ;;  %p509_p4 = scmp.lt.s32.totalorder %s27_s13, %s27_s13 }
   0xa   :  { %p505_p3 = scmp.ne.s32.totalorder %s27_s13, %s504_s21  ;;  %p510_p5 = scmp.lt.s32.totalorder %s504_s21, %s504_s21 }
   0xc   :  { %p511_p6 = por %p510_p5, %p509_p4 }
   0xe   :  { %p512_p7 = pnand %p511_p6, %p505_p3 }
  0x10   :  { %515 = shalt.err (!%p512_p7)
}
  0x11   :  { %s589_s22 = smov 64   ;;  %s590_s23 = smov 4  }
  0x12   :  { %32 = dma.hbm_to_vmem [thread:$0]  %s745_s1, 128, %s27_s13, [#allocation6], %s589_s22, %s589_s22, %s590_s23  }
  0x13   :  { %s591_s26 = smov [#allocation2]   ;;  %s592_s28 = smov [#allocation7]  }
  0x14   :  { %s17_s27 = sshll.u32 %s591_s26, 4  ;;  %s38_s29 = sshll.u32 %s592_s28, 4  ;;  %s18_s27 = int_to_ptr.vmem [resolvable:$true] %s17_s27  ;;  %s39_s29 = int_to_ptr.vmem [resolvable:$true] %s38_s29 }
  0x15   :  { %s516_s5 = scalar_lea.hbm %s744_s0, 128 }
  0x16   :  { %p517_p8 = scmp.ne.s32.totalorder %s744_s0, %s516_s5  ;;  %p520_p9 = scmp.lt.u32.totalorder %s516_s5, %s744_s0 }
  0x18   :  { %p522_p10 = pnand %p520_p9, %p517_p8 }
  0x1a   :  { %525 = shalt.err (!%p522_p10)
}
  0x1b   :  { %s526_s1 = scalar_lea.vmem %s18_s27, 128  ;;  %p531_p12 = scmp.lt.s32.totalorder %s18_s27, %s18_s27 }
  0x1c   :  { %p527_p11 = scmp.ne.s32.totalorder %s18_s27, %s526_s1  ;;  %p532_p13 = scmp.lt.s32.totalorder %s526_s1, %s526_s1 }
  0x1e   :  { %p533_p0 = por %p532_p13, %p531_p12 }
  0x20   :  { %p534_p1 = pnand %p533_p0, %p527_p11 }
  0x22   :  { %537 = shalt.err (!%p534_p1)
}
  0x23   :  { %20 = dma.hbm_to_vmem [thread:$0]  %s744_s0, 128, %s18_s27, [#allocation3]  }
  0x24   :  { %s538_s14 = scalar_lea.hbm %s746_s2, 2048 }
  0x25   :  { %p539_p2 = scmp.ne.s32.totalorder %s746_s2, %s538_s14  ;;  %p542_p3 = scmp.lt.u32.totalorder %s538_s14, %s746_s2 }
  0x27   :  { %p544_p4 = pnand %p542_p3, %p539_p2 }
  0x29   :  { %547 = shalt.err (!%p544_p4)
}
  0x2a   :  { %s548_s19 = scalar_lea.vmem %s39_s29, 2048  ;;  %p553_p6 = scmp.lt.s32.totalorder %s39_s29, %s39_s29 }
  0x2b   :  { %p549_p5 = scmp.ne.s32.totalorder %s39_s29, %s548_s19  ;;  %p554_p7 = scmp.lt.s32.totalorder %s548_s19, %s548_s19 }
  0x2d   :  { %p555_p8 = por %p554_p7, %p553_p6 }
  0x2f   :  { %p556_p9 = pnand %p555_p8, %p549_p5 }
  0x31   :  { %559 = shalt.err (!%p556_p9)
}
  0x32   :  { %s593_s0 = smov 128   ;;  %s594_s20 = smov 8  }
  0x33   :  { %44 = dma.hbm_to_vmem [thread:$0]  %s746_s2, 2048, %s39_s29, [#allocation6], %s593_s0, %s593_s0, %s594_s20  }
  0x34   :  { %582 = dma.done.wait [#allocation3], 128  }
  0x35   :  { %583 = vsyncadd [#allocation3], 4294967168 }
  0x36   :  { %584 = dma.done.wait [#allocation6], 2176  }
  0x37   :  { %585 = vsyncadd [#allocation6], 4294965120  ;;  %v595_v0 = vmov 0.0   ;;  %vm596_vm0 = vmmov 0   ;;  %v667_v1 = vld [vmem:[#allocation2] sm:$0xff]  ;;  %s597_s23 = smov 1   ;;  %v55_v2 = vlaneseq }
  0x38   :  { %392 = vmatprep.subr.bf16.mxu0 %v595_v0  ;;  %396 = vmatprep.mubr.msk.bf16.mxu0 %vm596_vm0, %v595_v0  ;;  %s598_s2 = smov 127   ;;  %vm599_vm2 = vmmov 1   ;;  %vm106_vm5 = vcmask 1043456   ;;  %v89_v13 = vld [vmem:[#allocation5] sm:$0xf]  ;;  %vm102_vm6 = vcmask 195584  }
  0x39   :  { %432 = vmatprep.mubr.msk.f32.mxu1 %vm596_vm0, %v595_v0  ;;  %90 = vrot.lane.b32.xlu0 %v667_v1, %s597_s23  ;;  %v673_v3 = vand.u32 127, %v55_v2  ;;  %v600_v23 = vmov 0   ;;  %v601_v27 = vmov 1   ;;  %v702_v28 = vld [vmem:[#allocation7 + $0x78] sm:$0xff]  ;;  %v73_v32 = vld [vmem:[#allocation7] sm:$0xff]  ;;  %v74_v33 = vld [vmem:[#allocation7 + $0x8] sm:$0xff] }
  0x3a   :  { %485 = vset.pattern.permute.xlu1 %v600_v23  ;;  %486 = vset.pattern.permute.xlu0 %v601_v27  ;;  %v75_v34 = vld [vmem:[#allocation7 + $0x10] sm:$0xff]  ;;  %v602_v35 = vmov 0.0|0.0   ;;  %v444_v36 = vpack.c.bf16 %v74_v33, %v73_v32  ;;  %v76_v37 = vld [vmem:[#allocation7 + $0x18] sm:$0xff]  ;;  %v77_v39 = vld [vmem:[#allocation7 + $0x20] sm:$0xff]  ;;  %s605_s24 = smov [#allocation8]  }
  0x3b   :  { %v61_v4 = vand.u32 15, %v673_v3  ;;  %vm71_vm7 = vcmp.lt.s32.totalorder %v673_v3, 64  ;;  %443 = vmatprep.subr.bf16.mxu1 %v602_v35  ;;  %v447_v38 = vpack.c.bf16 %v76_v37, %v75_v34  ;;  %v78_v40 = vld [vmem:[#allocation7 + $0x28] sm:$0xff]  ;;  %v79_v42 = vld [vmem:[#allocation7 + $0x30] sm:$0xff]  ;;  %v80_v43 = vld [vmem:[#allocation7 + $0x38] sm:$0xff]  ;;  %s350_s25 = sshll.u32 %s605_s24, 4  ;;  %s351_s25 = int_to_ptr.vmem [resolvable:$true] %s350_s25 }
  0x3c   :  { %445 = vmatpush3.bf16.msra.mxu1 %v444_v36  ;;  %v450_v41 = vpack.c.bf16 %v78_v40, %v77_v39  ;;  %v453_v44 = vpack.c.bf16 %v80_v43, %v79_v42  ;;  %v81_v45 = vld [vmem:[#allocation7 + $0x40] sm:$0xff]  ;;  %v82_v46 = vld [vmem:[#allocation7 + $0x48] sm:$0xff]  ;;  %v83_v48 = vld [vmem:[#allocation7 + $0x50] sm:$0xff]  ;;  %s560_s26 = scalar_lea.vmem %s351_s25, 128  ;;  %p565_p11 = scmp.lt.s32.totalorder %s351_s25, %s351_s25 }
  0x3d   :  { %95 = vrot.lane.b32.xlu0 %v667_v1, %s598_s2  ;;  %vm676_vm1 = vcmp.ne.s32.totalorder %v61_v4, 0  ;;  %vm683_vm4 = vcmp.ne.s32.totalorder %v61_v4, 15  ;;  %446 = vmatprep.subr.bf16.mxu1 %v602_v35  ;;  %v456_v47 = vpack.c.bf16 %v82_v46, %v81_v45  ;;  %v84_v49 = vld [vmem:[#allocation7 + $0x58] sm:$0xff]  ;;  %v85_v51 = vld [vmem:[#allocation7 + $0x60] sm:$0xff]  ;;  %v86_v52 = vld [vmem:[#allocation7 + $0x68] sm:$0xff]  ;;  %p561_p10 = scmp.ne.s32.totalorder %s351_s25, %s560_s26  ;;  %p566_p12 = scmp.lt.s32.totalorder %s560_s26, %s560_s26 }
  0x3e   :  { %vm360_vm3 = vmpackc.low %vm599_vm2, %vm676_vm1  ;;  %v459_v50 = vpack.c.bf16 %v84_v49, %v83_v48  ;;  %v462_v53 = vpack.c.bf16 %v86_v52, %v85_v51  ;;  %v87_v56 = vld [vmem:[#allocation7 + $0x70] sm:$0xff] }
  0x3f   :  { %v465_v57 = vpack.c.bf16 %v702_v28, %v87_v56  ;;  %vm365_vm8 = vmpackc.low %vm71_vm7, %vm676_vm1  ;;  %p567_p13 = por %p566_p12, %p565_p11 }
  0x40   :  { %448 = vmatpush3.bf16.msra.mxu1 %v447_v38 }
  0x41   :  { %449 = vmatprep.subr.bf16.mxu1 %v602_v35  ;;  %p568_p0 = pnand %p567_p13, %p561_p10 }
  0x44   :  { %451 = vmatpush3.bf16.msra.mxu1 %v450_v41 }
  0x45   :  { %452 = vmatprep.subr.bf16.mxu1 %v602_v35 }
  0x48   :  { %454 = vmatpush3.bf16.msra.mxu1 %v453_v44 }
  0x49   :  { %455 = vmatprep.subr.bf16.mxu1 %v602_v35 }
  0x4c   :  { %457 = vmatpush3.bf16.msra.mxu1 %v456_v47 }
  0x4d   :  { %458 = vmatprep.subr.bf16.mxu1 %v602_v35 }
  0x50   :  { %460 = vmatpush3.bf16.msra.mxu1 %v459_v50 }
  0x51   :  { %461 = vmatprep.subr.bf16.mxu1 %v602_v35 }
  0x54   :  { %463 = vmatpush3.bf16.msra.mxu1 %v462_v53 }
  0x55   :  { %464 = vmatprep.subr.bf16.mxu1 %v602_v35 }
  0x58   :  { %466 = vmatpush3.bf16.msra.mxu1 %v465_v57 }
  0xab   :  { %v91_v6 = vpop.permute.xlu0 %90 }
  0xac   :  { %v361_v7 = vpack.c.bf16 %v667_v1, %v91_v6 }
  0xae   :  { %393 = vmatpush3.bf16.msk.msra.mxu0 %vm360_vm3, %v361_v7 }
  0xaf   :  { %v96_v9 = vpop.permute.xlu0 %95  ;;  %394 = vmatprep.subr.bf16.mxu0 %v595_v0 }
  0xb0   :  { %v99_v10 = vsel %vm683_vm4, %v96_v9, 0.0 }
  0xb1   :  { %v101_v11 = vpack.c.bf16 %v99_v10, %v99_v10 }
  0xb3   :  { %v108_v12 = vsel %vm106_vm5, %v101_v11, 0  ;;  %v255_v11 = vld [vmem:[#allocation5 + $0x4] sm:$0xf] }
  0xb4   :  { %395 = vmatpush3.bf16.msra.mxu0 %v108_v12 }
  0xb5   :  { %435 = vmatprep.subr.bf16.mxu0 %v595_v0 }
  0xb7   :  { %397 = vmatmul.mubr.msk.bf16.vlgmr.msra.gmra.mrb[0].mxu0 %vm102_vm6, %v89_v13 }
  0xb8   :  { %439 = vmatprep.mubr.msk.bf16.mxu0 %vm596_vm0, %v595_v0 }
 0x18a   :  { %v695_v14 = vpop.f32.mrb[0].mxu0 }
 0x18b   :  { %150 = vadd.xlane.f32.xlu1 %v695_v14  ;;  %v398_v15 = vpop.f32.mrb[1].mxu0 }
 0x18c   :  { %v147_v16 = vpop.f32.mrb[2].mxu0 }
 0x18d   :  { %v399_v17 = vpop.f32.mrb[3].mxu0 }
 0x218   :  { %v151_v18 = vpop.xlane.xlu1 %150 }
 0x219   :  { %v152_v19 = vmul.f32 0.015625, %v151_v18 }
 0x21b   :  { %v153_v20 = vsub.f32 %v695_v14, %v152_v19 }
 0x21d   :  { %v156_v21 = vsel %vm71_vm7, %v153_v20, 0.0  ;;  %v603_v20 = vmov 2  }
 0x21e   :  { %v157_v22 = vmul.f32 %v156_v21, %v156_v21 }
 0x220   :  { %158 = vadd.xlane.f32.xlu1 %v157_v22 }
 0x2ad   :  { %v159_v24 = vpop.xlane.xlu1 %158 }
 0x2ae   :  { %v160_v25 = vmul.f32 0.015625, %v159_v24  ;;  %v604_v24 = vmov 3  }
 0x2b0   :  { %v161_v26 = vadd.f32 1e-05, %v160_v25 }
 0x2b2   :  { %490 = vrsqrt.f32 %v161_v26 }
 0x2bc   :  { %v491_v29 = vpop.eup %490 }
 0x2bd   :  { %v163_v30 = vmul.f32 %v491_v29, %v702_v28 }
 0x2bf   :  { %172 = vperm.xlu1 %485, %v163_v30   ;;  %v164_v31 = vmul.f32 %v163_v30, %v152_v19 }
 0x2c1   :  { %166 = vrot.lane.b32.xlu0 %v164_v31, %s597_s23 }
 0x2c3   :  { %487 = vset.pattern.permute.xlu1 %v603_v20 }
 0x333   :  { %v167_v54 = vpop.permute.xlu0 %166 }
 0x334   :  { %v169_v55 = vsub.f32 %v702_v28, %v167_v54 }
 0x336   :  { %178 = vperm.xlu0 %486, %v169_v55  }
 0x33a   :  { %489 = vset.pattern.permute.xlu0 %v604_v24 }
 0x33e   :  { %v173_v58 = vpop.permute.xlu1 %172 }
 0x33f   :  { %v175_v59 = vmul.f32 %v173_v58, %v695_v14 }
 0x3b5   :  { %v179_v60 = vpop.permute.xlu0 %178 }
 0x3b6   :  { %v181_v61 = vadd.f32 %v179_v60, %v175_v59 }
 0x3b8   :  { %v182_v62 = vmax.f32 %v181_v61, 0.0 }
 0x3ba   :  { %433 = vmatmul.mubr.msk.f32.vlgmr.msra.gmra.mrb[0].mxu1 %vm71_vm7, %v182_v62  ;;  %v183_v63 = vsel %vm71_vm7, %v182_v62, 0.0 }
 0x3bb   :  { %256 = vrot.lane.b32.xlu0 %v183_v63, %s597_s23 }
 0x3bf   :  { %259 = vrot.lane.b32.xlu0 %v183_v63, %s598_s2 }
 0x42d   :  { %v257_v2 = vpop.permute.xlu0 %256 }
 0x42e   :  { %v366_v4 = vpack.c.bf16 %v182_v62, %v257_v2 }
 0x430   :  { %436 = vmatpush3.bf16.msk.msra.mxu0 %vm365_vm8, %v366_v4 }
 0x431   :  { %v260_v6 = vpop.permute.xlu0 %259  ;;  %437 = vmatprep.subr.bf16.mxu0 %v595_v0 }
 0x432   :  { %v261_v7 = vsel %vm683_vm4, %v260_v6, 0.0 }
 0x433   :  { %v263_v9 = vpack.c.bf16 %v261_v7, %v261_v7 }
 0x435   :  { %v268_v10 = vsel %vm106_vm5, %v263_v9, 0 }
 0x436   :  { %438 = vmatpush3.bf16.msra.mxu0 %v268_v10 }
 0x439   :  { %440 = vmatmul.mubr.msk.bf16.vlgmr.msra.gmra.mrb[4].mxu0 %vm102_vm6, %v255_v11 }
 0x48d   :  { %v250_v5 = vpop.f32.mrb[0].mxu1 }
 0x48e   :  { %v434_v12 = vpop.f32.mrb[1].mxu1 }
 0x50c   :  { %v304_v13 = vpop.f32.mrb[4].mxu0 }
 0x50d   :  { %310 = vadd.xlane.f32.xlu1 %v304_v13  ;;  %v441_v14 = vpop.f32.mrb[5].mxu0 }
 0x50e   :  { %v307_v15 = vpop.f32.mrb[6].mxu0 }
 0x50f   :  { %v442_v16 = vpop.f32.mrb[7].mxu0 }
 0x59a   :  { %v311_v17 = vpop.xlane.xlu1 %310 }
 0x59b   :  { %v312_v18 = vmul.f32 0.015625, %v311_v17 }
 0x59d   :  { %v313_v0 = vsub.f32 %v304_v13, %v312_v18 }
 0x59f   :  { %v314_v8 = vsel %vm71_vm7, %v313_v0, 0.0 }
 0x5a0   :  { %v315_v19 = vmul.f32 %v314_v8, %v314_v8 }
 0x5a2   :  { %316 = vadd.xlane.f32.xlu0 %v315_v19 }
 0x62f   :  { %v317_v21 = vpop.xlane.xlu0 %316 }
 0x630   :  { %v318_v22 = vmul.f32 0.015625, %v317_v21 }
 0x632   :  { %v319_v23 = vadd.f32 1e-05, %v318_v22 }
 0x634   :  { %492 = vrsqrt.f32 %v319_v23 }
 0x63e   :  { %v493_v25 = vpop.eup %492 }
 0x63f   :  { %v321_v26 = vmul.f32 %v493_v25, %v702_v28 }
 0x641   :  { %330 = vperm.xlu1 %487, %v321_v26   ;;  %v322_v27 = vmul.f32 %v321_v26, %v312_v18 }
 0x643   :  { %324 = vrot.lane.b32.xlu0 %v322_v27, %s597_s23 }
 0x645   :  { %488 = vset.pattern.permute.xlu1 %v604_v24 }
 0x6b5   :  { %v325_v29 = vpop.permute.xlu0 %324 }
 0x6b6   :  { %v327_v30 = vsub.f32 %v702_v28, %v325_v29 }
 0x6b8   :  { %336 = vperm.xlu1 %488, %v327_v30  }
 0x6c0   :  { %v331_v31 = vpop.permute.xlu1 %330 }
 0x6c1   :  { %v333_v32 = vmul.f32 %v331_v31, %v304_v13 }
 0x737   :  { %v337_v33 = vpop.permute.xlu1 %336 }
 0x738   :  { %v339_v34 = vadd.f32 %v337_v33, %v333_v32 }
 0x73a   :  { %v340_v35 = vadd.f32 %v339_v34, %v667_v1 }
 0x73c   :  { %v341_v36 = vmax.f32 %v340_v35, 0.0 }
 0x73e   :  { %v342_v37 = vsel %vm71_vm7, %v341_v36, %v250_v5 }
 0x73f   :  { %343 = vst [vmem:[#allocation8] sm:$0xff] %v342_v37 }
 0x740   :  { %571 = shalt.err (!%p568_p0)
}
 0x741   :  { %s572_s29 = scalar_lea.hbm %s747_s3, 128 }
 0x742   :  { %p573_p1 = scmp.ne.s32.totalorder %s747_s3, %s572_s29  ;;  %p576_p2 = scmp.lt.u32.totalorder %s572_s29, %s747_s3 }
 0x744   :  { %p578_p3 = pnand %p576_p2, %p573_p1 }
 0x746   :  { %581 = shalt.err (!%p578_p3)
}
 0x747   :  { %353 = dma.vmem_to_hbm [thread:$0]  %s351_s25, 128, %s747_s3, [#allocation4]  }
 0x748   :  { %586 = dma.done.wait [#allocation4], 128  }
 0x749   :  { %587 = vsyncadd [#allocation4], 4294967168 }
 0x74a   :  { %357 = vsyncpa [#allocation3], 1 }
 0x74b   :  { %358 = vsyncpa [#allocation6], 1 }
 0x74c   :  { %359 = vsyncpa [#allocation4], 1 }

</bundles_post_ra>
